<compile_context>
chip_gen: v5e
topology: v5e:2x2
jax: 0.10.0
libtpu: 0.0.40
codegen_flags: <defaults>
</compile_context>

<pallas_src>
import jax
import jax.numpy as jnp
from jax.experimental import pallas as pl
from jax.experimental.pallas import tpu as pltpu


_LANE = 128
_TARGET_BLOCK_BYTES = 2 * 1024 * 1024  # ~2 MiB per block


def _relu_kernel(x_ref, o_ref):
    # Whole-tile elementwise max on the VPU; lane dim is a multiple of 128 so
    # stores stay unmasked (full vst, no vst.msk partials).
    o_ref[...] = jnp.maximum(x_ref[...], 0)


def _sublane_multiple(dtype):
    # Packed-sublane minimum: 8 rows for 32-bit, 16 for bf16, 32 for int8/fp8.
    itemsize = jnp.dtype(dtype).itemsize
    return max(8, 32 // max(itemsize, 1))


def _pick_lane_width(n_elems):
    # Fully flatten (ReLU is elementwise, layout-free) and choose the widest
    # lane width that divides the total element count.
    for lane in (2048, 1024, 512, 256, _LANE):
        if n_elems % lane == 0:
            return lane
    return None


def rectified_linear(x):
    """ReLU on an arbitrary-shaped array via a Pallas TPU kernel."""
    n = x.size
    dtype = x.dtype
    itemsize = jnp.dtype(dtype).itemsize
    sub = _sublane_multiple(dtype)

    # Small-input fast path: pallas_call launch + DMA setup costs more than
    # the whole op for sub-tile inputs; XLA's fused elementwise wins there.
    if n < sub * _LANE:
        return jnp.maximum(x, 0)

    lane = _pick_lane_width(n)
    if lane is None:
        # TODO(synk): element count not a multiple of 128; padding is not worth
        # it for a pure elementwise op -> fall back to XLA.
        return jnp.maximum(x, 0)

    rows = n // lane
    x2d = x.reshape(rows, lane)

    # Dtype-aware row tile sized for ~2 MiB per block (multiple of the packed
    # sublane count so the block satisfies the (8,128) tiling constraint).
    tile_rows = max(sub, (_TARGET_BLOCK_BYTES // (lane * itemsize)) // sub * sub)
    if tile_rows > rows:
        tile_rows = rows  # full-extent block is always legal

    grid = (pl.cdiv(rows, tile_rows),)

    out2d = pl.pallas_call(
        _relu_kernel,
        out_shape=jax.ShapeDtypeStruct((rows, lane), dtype),
        grid_spec=pl.GridSpec(
            grid=grid,
            in_specs=[pl.BlockSpec((tile_rows, lane), lambda i: (i, 0))],
            out_specs=pl.BlockSpec((tile_rows, lane), lambda i: (i, 0)),
        ),
        compiler_params=pltpu.CompilerParams(
            dimension_semantics=("parallel",),
        ),
    )(x2d)
    return out2d.reshape(x.shape)


class RectifiedLinear:
    """JAX/Pallas port of the PyTorch RectifiedLinear module (pure ReLU).

    input_dim / output_dim are kept only for kaldi-nnet export parity; the
    forward pass has no parameters.
    """

    def __init__(self, input_dim, output_dim):
        self.dim = input_dim

    def __call__(self, x):
        return rectified_linear(x)

    def to_kaldi_nnet(self):
        re_str = ''
        re_str += '<RectifiedLinear> %d %d\n' % (self.dim, self.dim)
        re_str += '<!EndOfComponent>\n'
        return re_str


if __name__ == "__main__":
    key = jax.random.PRNGKey(0)

    # Small FSMN-like shape: (batch, time, feature). Goes through the Pallas path.
    B, T, D = 2, 8, 128
    x = jax.random.normal(key, (B, T, D), dtype=jnp.float32)
    ref = jnp.maximum(x, 0.0)

    mod = RectifiedLinear(D, D)
    out = jax.block_until_ready(mod(x))
    assert out.shape == x.shape and out.dtype == x.dtype
    assert jnp.array_equal(out, ref)

    # bf16 input exercises the dtype-aware (16-row multiple) sublane tiling.
    xb = jax.random.normal(jax.random.PRNGKey(1), (4, 32, 256), dtype=jnp.bfloat16)
    refb = jnp.maximum(xb, 0)
    outb = jax.block_until_ready(rectified_linear(xb))
    assert outb.dtype == xb.dtype and jnp.array_equal(outb, refb)

    # Feature dim not a multiple of 128 -> fully-flattened lane-dense path.
    xo = jax.random.normal(jax.random.PRNGKey(2), (2, 16, 96), dtype=jnp.float32)
    refo = jnp.maximum(xo, 0.0)
    outo = jax.block_until_ready(rectified_linear(xo))
    assert outo.shape == xo.shape and jnp.array_equal(outo, refo)

    # Tiny / odd-sized input -> XLA fallback path.
    xt = jax.random.normal(jax.random.PRNGKey(3), (3, 5, 7), dtype=jnp.float32)
    outt = jax.block_until_ready(rectified_linear(xt))
    assert jnp.array_equal(outt, jnp.maximum(xt, 0.0))

    print("KERNEL_OK")
</pallas_src>

<mosaic_0001>
module attributes {stable_mosaic.version = 11 : i64} {
  func.func @_relu_kernel(%arg0: i32, %arg1: memref<1x2048xf32, #tpu.memory_space<vmem>>, %arg2: memref<1x2048xf32, #tpu.memory_space<vmem>>) attributes {dimension_semantics = [#tpu.dimension_semantics<parallel>], iteration_bounds = array<i64: 1>, scalar_prefetch = 0 : i64, scratch_operands = 0 : i64, tpu.core_type = #tpu.core_type<tc>, window_params = [{transform_indices = @transform_0, window_bounds = array<i64: 1, 2048>}, {transform_indices = @transform_1, window_bounds = array<i64: 1, 2048>}]} {
    %c0 = arith.constant 0 : index
    %c0_0 = arith.constant 0 : index
    %0 = vector.load %arg1[%c0, %c0_0] : memref<1x2048xf32, #tpu.memory_space<vmem>>, vector<1x2048xf32>
    %cst = arith.constant 0.000000e+00 : f32
    %1 = vector.broadcast %cst : f32 to vector<1x2048xf32>
    %2 = arith.maximumf %0, %1 : vector<1x2048xf32>
    %c0_1 = arith.constant 0 : index
    %c0_2 = arith.constant 0 : index
    %3 = vector.load %arg2[%c0_1, %c0_2] : memref<1x2048xf32, #tpu.memory_space<vmem>>, vector<1x2048xf32>
    tpu.vector_store %arg2[%c0_1, %c0_2], %2 {strides = array<i32>} : memref<1x2048xf32, #tpu.memory_space<vmem>>, vector<1x2048xf32>,
    return
  }
  func.func @transform_0(%arg0: i32) -> (i32, i32) {
    %c0_i32 = arith.constant 0 : i32
    %c0_i32_0 = arith.constant 0 : i32
    return %arg0, %c0_i32 : i32, i32
  }
  func.func @transform_1(%arg0: i32) -> (i32, i32) {
    %c0_i32 = arith.constant 0 : i32
    %c0_i32_0 = arith.constant 0 : i32
    return %arg0, %c0_i32 : i32, i32
  }
}

</mosaic_0001>

<bundles_post_ra>
// kernel: tpu_custom_call.1
= control target key start
LH: loop header
LB: loop body
LE: loop exit
PB: predicated region body
PF: predicated region fallthrough
CT: control target
= control target key end

     0   :  { %6 = vsyncpa [#allocation3], 0  ;;  %s118_s0 = inlined_call_operand.hbm [shape: f32[1,2048], index: 0, kind: input, shape index: {}]   ;;  %s119_s1 = inlined_call_operand.hbm [shape: f32[1,2048], index: 1, kind: output, shape index: {}]  }
   0x1   :  { %7 = vsyncpa [#allocation4], 0  ;;  %s13_s8 = sshll.u32 %s118_s0, 4  ;;  %s100_s9 = smov [#allocation2]   ;;  %s14_s8 = int_to_ptr.hbm [resolvable:$true] %s13_s8 }
   0x2   :  { %s15_s10 = sshll.u32 %s100_s9, 4  ;;  %s16_s10 = int_to_ptr.vmem [resolvable:$true] %s15_s10 }
   0x3   :  { %18 = dma.hbm_to_vmem [thread:$0]  %s14_s8, 256, %s16_s10, [#allocation3]  }
   0x4   :  { %96 = dma.done.wait [#allocation3], 256  }
   0x5   :  { %97 = vsyncadd [#allocation3], 4294967040  ;;  %s101_s11 = smov [#allocation5]   ;;  %s36_s15 = sshll.u32 %s119_s1, 4  ;;  %v23_v0 = vld [vmem:[#allocation2] sm:$0xff]  ;;  %v24_v1 = vld [vmem:[#allocation2 + $0x8] sm:$0xff]  ;;  %s37_s15 = int_to_ptr.hbm [resolvable:$true] %s36_s15 }
   0x6   :  { %s34_s12 = sshll.u32 %s101_s11, 4  ;;  %v25_v2 = vmax.f32 %v23_v0, 0.0  ;;  %v26_v3 = vmax.f32 %v24_v1, 0.0  ;;  %s35_s12 = int_to_ptr.vmem [resolvable:$true] %s34_s12 }
   0x8   :  { %27 = vst [vmem:[#allocation5] sm:$0xff] %v25_v2 }
   0x9   :  { %28 = vst [vmem:[#allocation5 + $0x8] sm:$0xff] %v26_v3 }
   0xa   :  { %39 = dma.vmem_to_hbm [thread:$0]  %s35_s12, 256, %s37_s15, [#allocation4]  }
   0xb   :  { %98 = dma.done.wait [#allocation4], 256  }
   0xc   :  { %99 = vsyncadd [#allocation4], 4294967040 }
   0xd   :  { %44 = vsyncpa [#allocation3], 1 }
   0xe   :  { %45 = vsyncpa [#allocation4], 1 }

</bundles_post_ra>
